<compile_context>
chip_gen: v7x
topology: tpu7x:2x2x1
jax: 0.10.0
libtpu: 0.0.40
codegen_flags: <defaults>
</compile_context>

<pallas_src>
import math

import jax
import jax.numpy as jnp
from jax.experimental import pallas as pl
from jax.experimental.pallas import tpu as pltpu


def _round_up(x, m):
    return ((x + m - 1) // m) * m


def _sublane_pack(dtype):
    """Sublane packing factor: 8 rows/vreg for 32-bit, 16 for 16-bit, 32 for 8-bit."""
    return {4: 8, 2: 16, 1: 32}[jnp.dtype(dtype).itemsize]


def _tile_candidates(target):
    return tuple(sorted({c for c in (128, 256, 384, 512, target) if 128 <= c <= target}))


def _best_tile(dim, candidates):
    """Candidate tile minimizing padding (prefer the larger tile on ties)."""
    return min(candidates, key=lambda c: (_round_up(dim, c) - dim, -c))


# ---------------------------------------------------------------------------
# Kernel: one (i, j, k) grid step of  out[i, j] = sum_k x[i, k] @ w[k, j] + b[j]
# ---------------------------------------------------------------------------
def _linear_kernel(x_ref, w_ref, b_ref, o_ref, acc_ref):
    k = pl.program_id(2)
    nk = pl.num_programs(2)

    @pl.when(k == 0)
    def _():
        # Seed the accumulator with the broadcast bias (saves the epilogue add).
        acc_ref[...] = jnp.broadcast_to(b_ref[...], acc_ref.shape)

    partial = jnp.dot(x_ref[...], w_ref[...], preferred_element_type=jnp.float32)

    @pl.when(k != nk - 1)
    def _():
        acc_ref[...] += partial

    @pl.when(k == nk - 1)
    def _():
        # Write output directly from (acc + dot) — no acc store-then-reload.
        o_ref[...] = (acc_ref[...] + partial).astype(o_ref.dtype)


# ---------------------------------------------------------------------------
# One-time parameter prep: cast + pad the weight/bias to the (tk, tn) grid.
# ---------------------------------------------------------------------------
_WEIGHT_RESIDENT_BUDGET = 4 * 1024 * 1024  # bytes; collapse j/k grid under this


def prepare_linear_params(weight_t, bias=None, *, compute_dtype=jnp.bfloat16,
                          tn_target=512, tk_target=512):
    """weight_t: [in_dim, out_dim] (pre-transposed). bias: [out_dim] or None.

    Returns a dict of padded/cast parameters + tiling metadata. Do this ONCE
    per layer; `linear_forward` then does no per-call work on the parameters.
    """
    in_dim, out_dim = weight_t.shape
    itemsize = jnp.dtype(compute_dtype).itemsize

    k_full = _round_up(in_dim, 128)
    n_full = _round_up(out_dim, 128)

    # Small/medium layer: keep the entire (padded) weight resident in VMEM so
    # it is fetched from HBM exactly once per call (j/k grid axes collapse).
    if (k_full * n_full * itemsize <= _WEIGHT_RESIDENT_BUDGET
            and k_full <= 2048 and n_full <= 2048):
        tk, tn = k_full, n_full
    else:
        tk = k_full if k_full <= tk_target else _best_tile(in_dim, _tile_candidates(tk_target))
        tn = n_full if n_full <= tn_target else _best_tile(out_dim, _tile_candidates(tn_target))

    k_pad = _round_up(in_dim, tk)
    n_pad = _round_up(out_dim, tn)

    w = weight_t.astype(compute_dtype)
    if (k_pad, n_pad) != (in_dim, out_dim):
        w = jnp.pad(w, ((0, k_pad - in_dim), (0, n_pad - out_dim)))

    if bias is None:
        b = jnp.zeros((1, n_pad), jnp.float32)
    else:
        b = bias.astype(jnp.float32).reshape(1, out_dim)
        if n_pad != out_dim:
            b = jnp.pad(b, ((0, 0), (0, n_pad - out_dim)))

    return {"w": w, "b": b, "in_dim": in_dim, "out_dim": out_dim,
            "tk": tk, "tn": tn, "compute_dtype": compute_dtype}


# ---------------------------------------------------------------------------
# Forward pass
# ---------------------------------------------------------------------------
def linear_forward(x, params, *, tm_target=512):
    """x: [..., in_dim] -> [..., out_dim]. Output dtype matches x.dtype."""
    in_dim, out_dim = params["in_dim"], params["out_dim"]
    tk, tn = params["tk"], params["tn"]
    w, b = params["w"], params["b"]
    compute_dtype = params["compute_dtype"]
    assert x.shape[-1] == in_dim

    lead_shape = x.shape[:-1]
    M = int(math.prod(lead_shape)) if lead_shape else 1
    out_dtype = x.dtype
    k_pad, n_pad = w.shape

    # tm: sublane-pack aligned; for large M pick the candidate minimizing padding.
    m_pack = max(_sublane_pack(compute_dtype), _sublane_pack(out_dtype))
    if M <= tm_target:
        tm = _round_up(M, m_pack)
    else:
        tm = _best_tile(M, _tile_candidates(tm_target))
    m_pad = _round_up(M, tm)

    x2d = x.reshape(M, in_dim).astype(compute_dtype)
    if (m_pad, k_pad) != (M, in_dim):
        # Zero-padding K is contraction-safe; padded rows are sliced off below.
        x2d = jnp.pad(x2d, ((0, m_pad - M), (0, k_pad - in_dim)))

    # v7x megacore: if the (i, j) grid collapsed to one tile, back off one notch
    # so both TensorCores get grid work (no-op on v5e/v6e and for tiny shapes).
    if (m_pad // tm) * (n_pad // tn) < 2:
        if tn % 256 == 0 and (n_pad // (tn // 2)) >= 2:
            tn //= 2
        elif tm % (2 * m_pack) == 0 and (m_pad // (tm // 2)) >= 2:
            tm //= 2

    grid = (m_pad // tm, n_pad // tn, k_pad // tk)
    n_i, n_j, n_k = grid

    xi = jnp.dtype(compute_dtype).itemsize
    oi = jnp.dtype(out_dtype).itemsize

    # Double-buffered working set -> explicit VMEM limit (safe for v7x's 64 MiB).
    footprint = (2 * tm * tk * xi + 2 * tk * tn * xi + 2 * tn * 4
                 + tm * tn * 4 + 2 * tm * tn * oi)
    vmem_limit = int(min(64 * 1024 * 1024, max(32 * 1024 * 1024, footprint * 2)))

    # Actual streaming traffic under (i, j, k) order with k innermost:
    #   x re-read per j-tile unless K collapsed; w re-read per i-tile unless
    #   both j and k collapsed (then Pallas skips re-DMA of the constant block).
    x_reads = n_j if n_k > 1 else 1
    w_reads = n_i if (n_j > 1 or n_k > 1) else 1
    cost = pl.CostEstimate(
        flops=2 * m_pad * n_pad * k_pad,
        transcendentals=0,
        bytes_accessed=(m_pad * k_pad * xi * x_reads
                        + k_pad * n_pad * xi * w_reads
                        + n_pad * 4 * w_reads
                        + m_pad * n_pad * oi),
    )

    out = pl.pallas_call(
        _linear_kernel,
        out_shape=jax.ShapeDtypeStruct((m_pad, n_pad), out_dtype),
        grid_spec=pltpu.PrefetchScalarGridSpec(
            num_scalar_prefetch=0,
            grid=grid,
            in_specs=[
                pl.BlockSpec((tm, tk), lambda i, j, k: (i, k)),   # x tile
                pl.BlockSpec((tk, tn), lambda i, j, k: (k, j)),   # w tile
                pl.BlockSpec((1, tn), lambda i, j, k: (0, j)),    # bias tile
            ],
            out_specs=pl.BlockSpec((tm, tn), lambda i, j, k: (i, j)),
            scratch_shapes=[pltpu.VMEM((tm, tn), jnp.float32)],
        ),
        compiler_params=pltpu.CompilerParams(
            dimension_semantics=("parallel", "parallel", "arbitrary"),
            vmem_limit_bytes=vmem_limit,
        ),
        cost_estimate=cost,
    )(x2d, w, b)

    out = out[:M, :out_dim]
    return out.reshape(*lead_shape, out_dim)


def linear_pallas(x, weight_t, bias, *, compute_dtype=jnp.bfloat16):
    """Convenience wrapper (preps the params every call). For repeated calls,
    call prepare_linear_params() once and reuse the result with linear_forward."""
    return linear_forward(x, prepare_linear_params(weight_t, bias,
                                                   compute_dtype=compute_dtype))


def init_linear_params(key, in_dim, out_dim, w_init="linear"):
    """Init matching the PyTorch module; weight stored PRE-TRANSPOSED as
    [in_dim, out_dim] (xavier_uniform_ bounds are symmetric in fan_in/fan_out,
    so the distribution is identical to PyTorch's [out_dim, in_dim] layout)."""
    kw, kb = jax.random.split(key)
    gain = 1.0  # nn.init.calculate_gain('linear') == 1.0
    bound_w = gain * math.sqrt(6.0 / (in_dim + out_dim))
    weight_t = jax.random.uniform(
        kw, (in_dim, out_dim), minval=-bound_w, maxval=bound_w, dtype=jnp.float32
    )
    # nn.Linear default bias init: U(-1/sqrt(fan_in), 1/sqrt(fan_in))
    bound_b = 1.0 / math.sqrt(in_dim)
    bias = jax.random.uniform(
        kb, (out_dim,), minval=-bound_b, maxval=bound_b, dtype=jnp.float32
    )
    return weight_t, bias


if __name__ == "__main__":
    key = jax.random.PRNGKey(0)
    k_x, k_p = jax.random.split(key)

    batch, seq, in_dim, out_dim = 2, 8, 32, 64
    x = jax.random.normal(k_x, (batch, seq, in_dim), dtype=jnp.float32)
    weight_t, bias = init_linear_params(k_p, in_dim, out_dim, w_init="linear")

    y_ref = x @ weight_t + bias  # plain-JAX reference

    # Default path: bf16 MXU operands, f32 accumulation (one-time param prep).
    params_bf16 = prepare_linear_params(weight_t, bias)
    y_bf16 = jax.block_until_ready(linear_forward(x, params_bf16))
    assert y_bf16.shape == (batch, seq, out_dim)
    assert jnp.allclose(y_bf16, y_ref, atol=5e-2, rtol=5e-2)

    # Opt-in strict-precision f32 operand path.
    params_f32 = prepare_linear_params(weight_t, bias, compute_dtype=jnp.float32)
    y_f32 = jax.block_until_ready(linear_forward(x, params_f32))
    assert y_f32.shape == (batch, seq, out_dim)
    assert jnp.allclose(y_f32, y_ref, atol=1e-5, rtol=1e-5)

    # TODO(synk): optional fp8 weight path (per-output-channel scales) for v7x.
    print("KERNEL_OK")
</pallas_src>

<mosaic_0001>
module attributes {stable_mosaic.version = 11 : i64} {
  func.func @_linear_kernel(%arg0: i32, %arg1: i32, %arg2: i32, %arg3: memref<16x128xbf16, #tpu.memory_space<vmem>>, %arg4: memref<128x128xbf16, #tpu.memory_space<vmem>>, %arg5: memref<1x128xf32, #tpu.memory_space<vmem>>, %arg6: memref<16x128xf32, #tpu.memory_space<vmem>>, %arg7: memref<16x128xf32, #tpu.memory_space<vmem>>) attributes {dimension_semantics = [#tpu.dimension_semantics<parallel>, #tpu.dimension_semantics<parallel>, #tpu.dimension_semantics<arbitrary>], iteration_bounds = array<i64: 1, 1, 1>, scalar_prefetch = 0 : i64, scratch_operands = 1 : i64, tpu.core_type = #tpu.core_type<tc>, window_params = [{transform_indices = @transform_0, window_bounds = array<i64: 16, 128>}, {transform_indices = @transform_1, window_bounds = array<i64: 128, 128>}, {transform_indices = @transform_2, window_bounds = array<i64: 1, 128>}, {transform_indices = @transform_3, window_bounds = array<i64: 16, 128>}]} {
    %c0_i32 = arith.constant 0 : i32
    %0 = arith.cmpi eq, %arg2, %c0_i32 : i32
    %1 = arith.extui %0 : i1 to i32
    %c0_i32_0 = arith.constant 0 : i32
    %2 = arith.cmpi ne, %1, %c0_i32_0 : i32
    scf.if %2 {
      %c0_8 = arith.constant 0 : index
      %c0_9 = arith.constant 0 : index
      %12 = vector.load %arg5[%c0_8, %c0_9] : memref<1x128xf32, #tpu.memory_space<vmem>>, vector<1x128xf32>
      %13 = vector.shape_cast %12 : vector<1x128xf32> to vector<1x128xf32>
      %14 = vector.broadcast %13 : vector<1x128xf32> to vector<16x128xf32>
      %c0_10 = arith.constant 0 : index
      %c0_11 = arith.constant 0 : index
      %15 = vector.load %arg7[%c0_10, %c0_11] : memref<16x128xf32, #tpu.memory_space<vmem>>, vector<16x128xf32>
      tpu.vector_store %arg7[%c0_10, %c0_11], %14 {strides = array<i32>} : memref<16x128xf32, #tpu.memory_space<vmem>>, vector<16x128xf32>,
    } else {
    }
    %c0 = arith.constant 0 : index
    %c0_1 = arith.constant 0 : index
    %3 = vector.load %arg3[%c0, %c0_1] : memref<16x128xbf16, #tpu.memory_space<vmem>>, vector<16x128xbf16>
    %c0_2 = arith.constant 0 : index
    %c0_3 = arith.constant 0 : index
    %4 = vector.load %arg4[%c0_2, %c0_3] : memref<128x128xbf16, #tpu.memory_space<vmem>>, vector<128x128xbf16>
    %cst = arith.constant dense<0.000000e+00> : vector<16x128xf32>
    %5 = tpu.matmul %3, %4, %cst {dimension_numbers = #tpu.dot_dimension_numbers<[1], [0], [0], [1], [0, 0, 1, 1], [], []>} : vector<16x128xbf16>, vector<128x128xbf16>, vector<16x128xf32> -> vector<16x128xf32>
    %c0_i32_4 = arith.constant 0 : i32
    %6 = arith.cmpi ne, %arg2, %c0_i32_4 : i32
    %7 = arith.extui %6 : i1 to i32
    %c0_i32_5 = arith.constant 0 : i32
    %8 = arith.cmpi ne, %7, %c0_i32_5 : i32
    scf.if %8 {
      %c0_8 = arith.constant 0 : index
      %c0_9 = arith.constant 0 : index
      %12 = vector.load %arg7[%c0_8, %c0_9] : memref<16x128xf32, #tpu.memory_space<vmem>>, vector<16x128xf32>
      %13 = arith.addf %12, %5 : vector<16x128xf32>
      %c0_10 = arith.constant 0 : index
      %c0_11 = arith.constant 0 : index
      %14 = vector.load %arg7[%c0_10, %c0_11] : memref<16x128xf32, #tpu.memory_space<vmem>>, vector<16x128xf32>
      tpu.vector_store %arg7[%c0_10, %c0_11], %13 {strides = array<i32>} : memref<16x128xf32, #tpu.memory_space<vmem>>, vector<16x128xf32>,
    } else {
    }
    %c0_i32_6 = arith.constant 0 : i32
    %9 = arith.cmpi eq, %arg2, %c0_i32_6 : i32
    %10 = arith.extui %9 : i1 to i32
    %c0_i32_7 = arith.constant 0 : i32
    %11 = arith.cmpi ne, %10, %c0_i32_7 : i32
    scf.if %11 {
      %c0_8 = arith.constant 0 : index
      %c0_9 = arith.constant 0 : index
      %12 = vector.load %arg7[%c0_8, %c0_9] : memref<16x128xf32, #tpu.memory_space<vmem>>, vector<16x128xf32>
      %13 = arith.addf %12, %5 : vector<16x128xf32>
      %c0_10 = arith.constant 0 : index
      %c0_11 = arith.constant 0 : index
      %14 = vector.load %arg6[%c0_10, %c0_11] : memref<16x128xf32, #tpu.memory_space<vmem>>, vector<16x128xf32>
      tpu.vector_store %arg6[%c0_10, %c0_11], %13 {strides = array<i32>} : memref<16x128xf32, #tpu.memory_space<vmem>>, vector<16x128xf32>,
    } else {
    }
    return
  }
  func.func @transform_0(%arg0: i32, %arg1: i32, %arg2: i32) -> (i32, i32) {
    %c0_i32 = arith.constant 0 : i32
    return %arg0, %arg2 : i32, i32
  }
  func.func @transform_1(%arg0: i32, %arg1: i32, %arg2: i32) -> (i32, i32) {
    %c0_i32 = arith.constant 0 : i32
    return %arg2, %arg1 : i32, i32
  }
  func.func @transform_2(%arg0: i32, %arg1: i32, %arg2: i32) -> (i32, i32) {
    %c0_i32 = arith.constant 0 : i32
    %c0_i32_0 = arith.constant 0 : i32
    return %c0_i32, %arg1 : i32, i32
  }
  func.func @transform_3(%arg0: i32, %arg1: i32, %arg2: i32) -> (i32, i32) {
    %c0_i32 = arith.constant 0 : i32
    return %arg0, %arg1 : i32, i32
  }
}

</mosaic_0001>

<bundles_post_ra>
// kernel: tpu_custom_call.1
= control target key start
LH: loop header
LB: loop body
LE: loop exit
PB: predicated region body
PF: predicated region fallthrough
CT: control target
= control target key end

     0   :  { %8 = vsyncpa [#allocation4], 0  ;;  %s404_s0 = inlined_call_operand.hbm [shape: bf16[16,128], index: 0, kind: input, shape index: {}]   ;;  %s405_s1 = inlined_call_operand.hbm [shape: bf16[128,128], index: 1, kind: input, shape index: {}]   ;;  %s406_s2 = inlined_call_operand.vmem [shape: f32[1,128], index: 2, kind: input, shape index: {}]   ;;  %s407_s3 = inlined_call_operand.hbm [shape: f32[16,128], index: 3, kind: output, shape index: {}]  }
   0x1   :  { %9 = vsyncpa [#allocation7], 0 }
   0x2   :  { %10 = vsyncpa [#allocation5], 0  ;;  %s336_s12 = smov [#allocation3]   ;;  %s264_s16 = scalar_lea.hbm %s404_s0, 128 }
   0x3   :  { %s16_s13 = sshll.u32 %s336_s12, 4  ;;  %p265_p0 = scmp.ne.s32.totalorder %s404_s0, %s264_s16  ;;  %s17_s13 = int_to_ptr.vmem [resolvable:$true] %s16_s13 }
   0x4   :  { %p268_p1 = scmp.lt.u32.totalorder %s264_s16, %s404_s0 }
   0x6   :  { %p270_p2 = pnand %p268_p1, %p265_p0 }
   0x8   :  { %273 = shalt.err (!%p270_p2)
}
   0x9   :  { %s274_s21 = scalar_lea.vmem %s17_s13, 128  ;;  %p279_p4 = scmp.lt.s32.totalorder %s17_s13, %s17_s13 }
   0xa   :  { %p275_p3 = scmp.ne.s32.totalorder %s17_s13, %s274_s21  ;;  %p280_p5 = scmp.lt.s32.totalorder %s274_s21, %s274_s21 }
   0xc   :  { %p281_p6 = por %p280_p5, %p279_p4 }
   0xe   :  { %p282_p7 = pnand %p281_p6, %p275_p3 }
  0x10   :  { %285 = shalt.err (!%p282_p7)
}
  0x11   :  { %s337_s22 = smov 64   ;;  %s338_s23 = smov 4  }
  0x12   :  { %22 = dma.hbm_to_vmem [thread:$0]  %s404_s0, 128, %s17_s13, [#allocation4], %s337_s22, %s337_s22, %s338_s23  }
  0x13   :  { %s339_s26 = smov [#allocation6]   ;;  %s286_s30 = scalar_lea.hbm %s405_s1, 1024 }
  0x14   :  { %s28_s27 = sshll.u32 %s339_s26, 4  ;;  %p287_p8 = scmp.ne.s32.totalorder %s405_s1, %s286_s30  ;;  %s29_s27 = int_to_ptr.vmem [resolvable:$true] %s28_s27 }
  0x15   :  { %p290_p9 = scmp.lt.u32.totalorder %s286_s30, %s405_s1 }
  0x17   :  { %p292_p10 = pnand %p290_p9, %p287_p8 }
  0x19   :  { %295 = shalt.err (!%p292_p10)
}
  0x1a   :  { %s296_s8 = scalar_lea.vmem %s29_s27, 1024  ;;  %p301_p12 = scmp.lt.s32.totalorder %s29_s27, %s29_s27 }
  0x1b   :  { %p297_p11 = scmp.ne.s32.totalorder %s29_s27, %s296_s8  ;;  %p302_p13 = scmp.lt.s32.totalorder %s296_s8, %s296_s8 }
  0x1d   :  { %p303_p0 = por %p302_p13, %p301_p12 }
  0x1f   :  { %p304_p1 = pnand %p303_p0, %p297_p11 }
  0x21   :  { %307 = shalt.err (!%p304_p1)
}
  0x22   :  { %34 = dma.hbm_to_vmem [thread:$0]  %s405_s1, 1024, %s29_s27, [#allocation7], %s337_s22, %s337_s22, %s338_s23  }
  0x23   :  { %330 = dma.done.wait [#allocation4], 128  }
  0x24   :  { %331 = vsyncadd [#allocation4], 4294967168 }
  0x25   :  { %332 = dma.done.wait [#allocation7], 1024  }
  0x26   :  { %333 = vsyncadd [#allocation7], 4294966272  ;;  %v340_v0 = vmov 0.0   ;;  %vm341_vm0 = vmmov 0   ;;  %v255_v1 = vld [vmem:[#allocation6] sm:$0xff]   ;;  %v256_v2 = vld [vmem:[#allocation6 + $0x8] sm:$0xff]  }
  0x27   :  { %226 = vmatprep.subr.bf16.mxu0 %v340_v0  ;;  %242 = vmatprep.mubr.msk.bf16.mxu0 %vm341_vm0, %v340_v0  ;;  %v257_v3 = vld [vmem:[#allocation6 + $0x10] sm:$0xff]   ;;  %v258_v4 = vld [vmem:[#allocation6 + $0x18] sm:$0xff]   ;;  %v259_v5 = vld [vmem:[#allocation6 + $0x20] sm:$0xff]   ;;  %s342_s11 = smov [#allocation8]  }
  0x28   :  { %227 = vmatpush3.bf16.msra.mxu0 %v255_v1  ;;  %v260_v6 = vld [vmem:[#allocation6 + $0x28] sm:$0xff]   ;;  %v261_v7 = vld [vmem:[#allocation6 + $0x30] sm:$0xff]   ;;  %v262_v8 = vld [vmem:[#allocation6 + $0x38] sm:$0xff]   ;;  %s194_s12 = sshll.u32 %s342_s11, 4  ;;  %s195_s12 = int_to_ptr.vmem [resolvable:$true] %s194_s12 }
  0x29   :  { %228 = vmatprep.subr.bf16.mxu0 %v340_v0  ;;  %v263_v9 = vld [vmem:[#allocation3] sm:$0xff]   ;;  %s308_s13 = scalar_lea.vmem %s195_s12, 256  ;;  %p313_p3 = scmp.lt.s32.totalorder %s195_s12, %s195_s12 }
  0x2a   :  { %v207_v10 = vld [vmem:[%s406_s2] ss:$0 sm:$0xff]  ;;  %p309_p2 = scmp.ne.s32.totalorder %s195_s12, %s308_s13  ;;  %p314_p4 = scmp.lt.s32.totalorder %s308_s13, %s308_s13 }
  0x2c   :  { %229 = vmatpush3.bf16.msra.mxu0 %v256_v2  ;;  %p315_p5 = por %p314_p4, %p313_p3 }
  0x2d   :  { %230 = vmatprep.subr.bf16.mxu0 %v340_v0 }
  0x2e   :  { %p316_p6 = pnand %p315_p5, %p309_p2 }
  0x30   :  { %231 = vmatpush3.bf16.msra.mxu0 %v257_v3 }
  0x31   :  { %232 = vmatprep.subr.bf16.mxu0 %v340_v0 }
  0x34   :  { %233 = vmatpush3.bf16.msra.mxu0 %v258_v4 }
  0x35   :  { %234 = vmatprep.subr.bf16.mxu0 %v340_v0 }
  0x38   :  { %235 = vmatpush3.bf16.msra.mxu0 %v259_v5 }
  0x39   :  { %236 = vmatprep.subr.bf16.mxu0 %v340_v0 }
  0x3c   :  { %237 = vmatpush3.bf16.msra.mxu0 %v260_v6 }
  0x3d   :  { %238 = vmatprep.subr.bf16.mxu0 %v340_v0 }
  0x40   :  { %239 = vmatpush3.bf16.msra.mxu0 %v261_v7 }
  0x41   :  { %240 = vmatprep.subr.bf16.mxu0 %v340_v0 }
  0x44   :  { %241 = vmatpush3.bf16.msra.mxu0 %v262_v8 }
  0x47   :  { %243 = vmatmul.mubr.bf16.vlgmr.msra.gmra.mrb[0].mxu0 %v263_v9 }
 0x11a   :  { %v163_v11 = vpop.f32.mrb[0].mxu0 }
 0x11b   :  { %v185_v12 = vadd.f32 %v207_v10, %v163_v11  ;;  %v244_v13 = vpop.f32.mrb[1].mxu0 }
 0x11c   :  { %v166_v14 = vpop.f32.mrb[2].mxu0 }
 0x11d   :  { %187 = vst [vmem:[#allocation8] sm:$0xff] %v185_v12  ;;  %v186_v15 = vadd.f32 %v207_v10, %v166_v14  ;;  %v245_v16 = vpop.f32.mrb[3].mxu0 }
 0x11f   :  { %188 = vst [vmem:[#allocation8 + $0x8] sm:$0xff] %v186_v15 }
 0x120   :  { %319 = shalt.err (!%p316_p6)
}
 0x121   :  { %s320_s15 = scalar_lea.hbm %s407_s3, 256 }
 0x122   :  { %p321_p7 = scmp.ne.s32.totalorder %s407_s3, %s320_s15  ;;  %p324_p8 = scmp.lt.u32.totalorder %s320_s15, %s407_s3 }
 0x124   :  { %p326_p9 = pnand %p324_p8, %p321_p7 }
 0x126   :  { %329 = shalt.err (!%p326_p9)
}
 0x127   :  { %s343_s20 = smov 128   ;;  %s344_s21 = smov 8  }
 0x128   :  { %200 = dma.vmem_to_hbm [thread:$0]  %s195_s12, 256, %s407_s3, [#allocation5], %s343_s20, %s343_s20, %s344_s21  }
 0x129   :  { %334 = dma.done.wait [#allocation5], 256  }
 0x12a   :  { %335 = vsyncadd [#allocation5], 4294967040 }
 0x12b   :  { %204 = vsyncpa [#allocation4], 1 }
 0x12c   :  { %205 = vsyncpa [#allocation7], 1 }
 0x12d   :  { %206 = vsyncpa [#allocation5], 1 }

</bundles_post_ra>
